<compile_context>
chip_gen: v5e
topology: v5e:2x2
jax: 0.10.0
libtpu: 0.0.40
codegen_flags: <defaults>
</compile_context>

<pallas_src>
from functools import partial
from itertools import permutations

import jax
import jax.numpy as jnp
from jax import lax
from jax.experimental import pallas as pl
from jax.experimental.pallas import tpu as pltpu

EPS = 1e-16  # matches SiSNR_With_Pit.epsilon


def _sisnr_stats_kernel(lens_ref, est_ref, src_ref, out_ref, gram_acc, tail_acc,
                        *, total_t):
    """Accumulate SI-SNR sufficient statistics over T tiles; finalize [C, C].

    lens_ref : SMEM int32 [B]        (scalar-prefetched source_lengths, clamped to T)
    est_ref  : VMEM      [1, C, TT]  (estimate_source, one batch, one T tile)
    src_ref  : VMEM      [1, C, TT]  (source, one batch, one T tile)
    out_ref  : VMEM f32  [1, C, C]   (pairwise SI-SNR, written at the last tile)
    gram_acc : VMEM f32  [Rp, Rp]    Gram of Y = [em; sm; ones] (Rp = pad8(2C+1))
    tail_acc : VMEM f32  [1, C]      sum of source over n <= t < T (torch mean quirk)
    """
    b = pl.program_id(0)
    kt = pl.program_id(1)
    n = lens_ref[b]                                   # valid length (int32)

    C = est_ref.shape[1]
    TT = est_ref.shape[2]
    Rp = gram_acc.shape[0]

    @pl.when(kt == 0)
    def _init():
        gram_acc[...] = jnp.zeros_like(gram_acc)
        tail_acc[...] = jnp.zeros_like(tail_acc)

    # Compute dtype: keep bf16 if the caller supplied bf16 (halves HBM bytes),
    # otherwise f32.  Accumulation is always f32 via preferred_element_type.
    cdt = jnp.bfloat16 if est_ref.dtype == jnp.dtype(jnp.bfloat16) else jnp.float32
    est = est_ref[0].astype(cdt)                      # [C, TT]
    src = src_ref[0].astype(cdt)                      # [C, TT]

    tile_start = kt * TT
    n_local = n - tile_start                          # scalar: valid samples in this tile
    data_len = jnp.minimum(total_t - tile_start, TT)  # scalar: in-bounds samples in this tile

    dims = (((1,), (1,)), ((), ()))                   # contract the time axis

    def accumulate_gram(e, s):
        # Y = [e rows | s rows | ones row | zero pad rows]  -> one MXU Gram.
        ones = jnp.ones((1, TT), cdt)
        parts = [e, s, ones]
        if Rp > 2 * C + 1:
            parts.append(jnp.zeros((Rp - 2 * C - 1, TT), cdt))
        y = jnp.concatenate(parts, axis=0)            # [Rp, TT]
        gram_acc[...] += lax.dot_general(y, y, dims,
                                         preferred_element_type=jnp.float32)

    def accumulate_tail(tail_mask):
        # Unmasked-source-sum quirk: mean_target divides sum(source over [0, T))
        # by source_lengths.  The t < n part lives in the Gram ones-row; here we
        # accumulate the n <= t < T remainder (rare tiles only).
        s_tail = jnp.where(tail_mask, src, 0)
        ones = jnp.ones((1, TT), cdt)
        tail_acc[...] += lax.dot_general(ones, s_tail, dims,
                                         preferred_element_type=jnp.float32)

    @pl.when(n_local >= TT)
    def _fully_valid_tile():
        # Fast path (vast majority of tiles): no iota, no compare, no select.
        accumulate_gram(est, src)

    @pl.when(jnp.logical_and(n_local > 0, n_local < TT))
    def _boundary_tile():
        # At most one per batch item.  Local lane iota vs. n - kt*TT.
        t = lax.broadcasted_iota(jnp.int32, (C, TT), 1)
        in_len = t < n_local                          # t < source_lengths[b]
        in_data = t < data_len                        # t < T (guards overhanging-block garbage)
        em = jnp.where(in_len, est, 0)                # NaN-safe masking (never x*mask)
        sm = jnp.where(in_len, src, 0)
        accumulate_gram(em, sm)
        accumulate_tail(jnp.logical_and(jnp.logical_not(in_len), in_data))

    @pl.when(n_local <= 0)
    def _fully_past_tile():
        # Only the unmasked source sum still matters here.
        t = lax.broadcasted_iota(jnp.int32, (C, TT), 1)
        accumulate_tail(t < data_len)

    @pl.when(kt == pl.num_programs(1) - 1)
    def _finalize():
        g = gram_acc[...]                             # [Rp, Rp] f32
        nf = n.astype(jnp.float32)
        inv_n = 1.0 / nf                              # div-by-zero if n == 0, as in torch

        # Row layout of Y: [0, C) = masked estimate, [C, 2C) = masked source, 2C = ones.
        d_es = g[0:C, C:2 * C]                        # sum_t em_i * sm_j            [C, C]
        sum_em = g[0:C, 2 * C:2 * C + 1]              # sum_t em_i                   [C, 1]
        sum_sm_row = g[2 * C:2 * C + 1, C:2 * C]      # sum_t sm_j                   [1, C]

        ri = lax.broadcasted_iota(jnp.int32, (C, C), 0)
        ci = lax.broadcasted_iota(jnp.int32, (C, C), 1)
        eye = (ri == ci).astype(jnp.float32)
        sum_ee = jnp.sum(eye * g[0:C, 0:C], axis=1, keepdims=True)              # [C, 1]
        sum_tt_row = jnp.sum(eye * g[C:2 * C, C:2 * C], axis=0, keepdims=True)  # [1, C]

        sum_src_row = sum_sm_row + tail_acc[...]      # unmasked source sum          [1, C]

        me = sum_em * inv_n                           # estimate means (masked)      [C, 1]
        mt_row = sum_src_row * inv_n                  # target means (torch quirk)   [1, C]

        # Closed-form zero-mean energies / pairwise dot (one-pass formulation).
        ze_pow = sum_ee - sum_em * me                                            # [C, 1]
        zt_pow = sum_tt_row - 2.0 * mt_row * sum_sm_row + nf * mt_row * mt_row   # [1, C]
        dot = d_es - me * sum_sm_row                                             # [C, C]

        energy = zt_pow + EPS
        inv_e = 1.0 / energy
        d2 = dot * dot
        proj_pow = d2 * zt_pow * (inv_e * inv_e)      # sum_t proj^2
        noise_pow = ze_pow - 2.0 * d2 * inv_e + proj_pow
        noise_pow = jnp.maximum(noise_pow, 0.0)       # guard f32 cancellation round-off
        out_ref[0] = 10.0 * jnp.log10(proj_pow / (noise_pow + EPS) + EPS)


def sisnr_with_pit_loss(estimate_source, source, source_lengths, *,
                        time_tile=65536):
    """JAX/Pallas equivalent of SiSNR_With_Pit.forward."""
    assert estimate_source.shape == source.shape
    B, C, T = source.shape
    assert time_tile % 128 == 0 and time_tile > 0
    # source_lengths is specified to lie in [0, T]; clamp defensively so the
    # fully-valid fast path can never touch the padded tail of the last block.
    lens = jnp.minimum(source_lengths.astype(jnp.int32), T)

    # Tile selection: tt is a multiple of 128 (lane-aligned MXU contractions)
    # and never exceeds T, so only the *last* grid block may overhang past T;
    # that overhang is jnp.where-masked inside the kernel.  No jnp.pad copy.
    if T % 128 == 0:
        tt = min(time_tile, T)
    elif T > 128:
        tt = min(time_tile, (T // 128) * 128)
    else:
        tt = T  # tiny inputs: a single short block
    kt = pl.cdiv(T, tt)

    rows = 2 * C + 1                        # [est rows | src rows | ones row]
    rows_padded = ((rows + 7) // 8) * 8     # pad to a full sublane group

    grid_spec = pltpu.PrefetchScalarGridSpec(
        num_scalar_prefetch=1,
        grid=(B, kt),
        in_specs=[
            pl.BlockSpec((1, C, tt), lambda b, k, lens_ref: (b, 0, k)),   # estimate
            pl.BlockSpec((1, C, tt), lambda b, k, lens_ref: (b, 0, k)),   # source
        ],
        out_specs=pl.BlockSpec((1, C, C), lambda b, k, lens_ref: (b, 0, 0)),
        scratch_shapes=[
            pltpu.VMEM((rows_padded, rows_padded), jnp.float32),  # Gram accumulator
            pltpu.VMEM((1, C), jnp.float32),                      # unmasked src tail sum
        ],
    )

    si_snr = pl.pallas_call(
        partial(_sisnr_stats_kernel, total_t=T),
        out_shape=jax.ShapeDtypeStruct((B, C, C), jnp.float32),
        grid_spec=grid_spec,
        compiler_params=pltpu.CompilerParams(
            dimension_semantics=("parallel", "arbitrary"),
            vmem_limit_bytes=48 * 1024 * 1024),
    )(lens, estimate_source, source)

    # TODO(synk): for B == 1 on v7x, split the T reduction across the two
    # TensorCores (per-core partial Grams combined here) to avoid idling a core.

    # PIT permutation max: O(B * C! * C) glue on the tiny [B, C, C] output.
    perms = jnp.array(list(permutations(range(C))), dtype=jnp.int32)      # [P, C]
    perms_one_hot = jax.nn.one_hot(perms, C, dtype=jnp.float32)           # [P, C, C]
    snr_set = jnp.einsum('bij,pij->bp', si_snr, perms_one_hot)            # [B, P]
    max_snr = jnp.max(snr_set, axis=1) / C
    return 20.0 - jnp.mean(max_snr)


def _reference_loss(estimate_source, source, source_lengths):
    """Pure-JAX reference mirroring the PyTorch module (explicit projection)."""
    B, C, T = source.shape
    mask = (jnp.arange(T)[None, None, :] < source_lengths[:, None, None]).astype(
        jnp.float32)
    est = estimate_source * mask
    n = source_lengths.reshape(B, 1, 1).astype(jnp.float32)
    zm_tgt = (source - jnp.sum(source, 2, keepdims=True) / n) * mask
    zm_est = (est - jnp.sum(est, 2, keepdims=True) / n) * mask
    s_tgt = zm_tgt[:, None, :, :]
    s_est = zm_est[:, :, None, :]
    dot = jnp.sum(s_est * s_tgt, 3, keepdims=True)
    energy = jnp.sum(s_tgt ** 2, 3, keepdims=True) + EPS
    proj = dot * s_tgt / energy
    noise = s_est - proj
    snr = jnp.sum(proj ** 2, 3) / (jnp.sum(noise ** 2, 3) + EPS)
    snr = 10.0 * jnp.log10(snr + EPS)
    perms = jnp.array(list(permutations(range(C))), dtype=jnp.int32)
    ph = jax.nn.one_hot(perms, C, dtype=jnp.float32)
    snr_set = jnp.einsum('bij,pij->bp', snr, ph)
    max_snr = jnp.max(snr_set, axis=1) / C
    return 20.0 - jnp.mean(max_snr)


if __name__ == "__main__":
    key = jax.random.PRNGKey(0)
    k1, k2, k3, k4 = jax.random.split(key, 4)

    # T deliberately NOT a multiple of 128: exercises the overhanging last block.
    B, C, T = 2, 3, 300
    source = jax.random.normal(k1, (B, C, T), dtype=jnp.float32)
    estimate_source = source + 0.3 * jax.random.normal(k2, (B, C, T),
                                                       dtype=jnp.float32)
    source_lengths = jnp.array([T, 200], dtype=jnp.int32)

    ref = _reference_loss(estimate_source, source, source_lengths)

    # Default tiling: tt=256, cdiv grid with an overhanging last block
    # (covers fully-valid, boundary and fully-past tile paths + OOB masking).
    loss = jax.block_until_ready(
        sisnr_with_pit_loss(estimate_source, source, source_lengths))
    assert jnp.allclose(loss, ref, rtol=1e-3, atol=1e-3), (loss, ref)

    # Smaller tile: more grid steps over the running Gram / tail accumulators.
    loss_tiled = jax.block_until_ready(
        sisnr_with_pit_loss(estimate_source, source, source_lengths,
                            time_tile=128))
    assert jnp.allclose(loss_tiled, ref, rtol=1e-3, atol=1e-3), (loss_tiled, ref)

    # Exact 128-multiple T with full lengths: pure fully-valid fast path.
    B2, C2, T2 = 2, 3, 256
    src2 = jax.random.normal(k3, (B2, C2, T2), dtype=jnp.float32)
    est2 = src2 + 0.5 * jax.random.normal(k4, (B2, C2, T2), dtype=jnp.float32)
    lens2 = jnp.array([T2, T2], dtype=jnp.int32)
    ref2 = _reference_loss(est2, src2, lens2)
    loss2 = jax.block_until_ready(sisnr_with_pit_loss(est2, src2, lens2))
    assert jnp.allclose(loss2, ref2, rtol=1e-3, atol=1e-3), (loss2, ref2)

    print("KERNEL_OK")
</pallas_src>

<mosaic_0001>
module attributes {stable_mosaic.version = 11 : i64} {
  func.func @_sisnr_stats_kernel(%arg0: i32, %arg1: i32, %arg2: memref<2xi32, #tpu.memory_space<smem>>, %arg3: memref<1x3x256xf32, #tpu.memory_space<vmem>>, %arg4: memref<1x3x256xf32, #tpu.memory_space<vmem>>, %arg5: memref<1x3x3xf32, #tpu.memory_space<vmem>>, %arg6: memref<8x8xf32, #tpu.memory_space<vmem>>, %arg7: memref<1x3xf32, #tpu.memory_space<vmem>>) attributes {dimension_semantics = [#tpu.dimension_semantics<parallel>, #tpu.dimension_semantics<arbitrary>], iteration_bounds = array<i64: 2, 2>, scalar_prefetch = 1 : i64, scratch_operands = 2 : i64, tpu.core_type = #tpu.core_type<tc>, window_params = [{transform_indices = @transform_0, window_bounds = array<i64: 1, 3, 256>}, {transform_indices = @transform_1, window_bounds = array<i64: 1, 3, 256>}, {transform_indices = @transform_2, window_bounds = array<i64: 1, 3, 3>}]} {
    %0 = arith.index_cast %arg0 : i32 to index
    %1 = memref.load %arg2[%0] : memref<2xi32, #tpu.memory_space<smem>>
    %c0_i32 = arith.constant 0 : i32
    %2 = arith.cmpi eq, %arg1, %c0_i32 : i32
    %3 = arith.extui %2 : i1 to i32
    %c0_i32_0 = arith.constant 0 : i32
    %4 = arith.cmpi ne, %3, %c0_i32_0 : i32
    scf.if %4 {
      %cst = arith.constant 0.000000e+00 : f32
      %27 = vector.broadcast %cst : f32 to vector<8x8xf32>
      %c0_15 = arith.constant 0 : index
      %c0_16 = arith.constant 0 : index
      %28 = vector.load %arg6[%c0_15, %c0_16] : memref<8x8xf32, #tpu.memory_space<vmem>>, vector<8x8xf32>
      tpu.vector_store %arg6[%c0_15, %c0_16], %27 {strides = array<i32>} : memref<8x8xf32, #tpu.memory_space<vmem>>, vector<8x8xf32>,
      %cst_17 = arith.constant 0.000000e+00 : f32
      %29 = vector.broadcast %cst_17 : f32 to vector<1x3xf32>
      %c0_18 = arith.constant 0 : index
      %c0_19 = arith.constant 0 : index
      %30 = vector.load %arg7[%c0_18, %c0_19] : memref<1x3xf32, #tpu.memory_space<vmem>>, vector<1x3xf32>
      tpu.vector_store %arg7[%c0_18, %c0_19], %29 {strides = array<i32>} : memref<1x3xf32, #tpu.memory_space<vmem>>, vector<1x3xf32>,
    } else {
    }
    %c0 = arith.constant 0 : index
    %c0_1 = arith.constant 0 : index
    %c0_2 = arith.constant 0 : index
    %5 = vector.load %arg3[%c0, %c0_1, %c0_2] : memref<1x3x256xf32, #tpu.memory_space<vmem>>, vector<1x3x256xf32>
    %6 = vector.shape_cast %5 : vector<1x3x256xf32> to vector<3x256xf32>
    %c0_3 = arith.constant 0 : index
    %c0_4 = arith.constant 0 : index
    %c0_5 = arith.constant 0 : index
    %7 = vector.load %arg4[%c0_3, %c0_4, %c0_5] : memref<1x3x256xf32, #tpu.memory_space<vmem>>, vector<1x3x256xf32>
    %8 = vector.shape_cast %7 : vector<1x3x256xf32> to vector<3x256xf32>
    %c256_i32 = arith.constant 256 : i32
    %9 = arith.muli %arg1, %c256_i32 : i32
    %10 = arith.subi %1, %9 : i32
    %c300_i32 = arith.constant 300 : i32
    %11 = arith.subi %c300_i32, %9 : i32
    %c256_i32_6 = arith.constant 256 : i32
    %12 = arith.minsi %11, %c256_i32_6 : i32
    %c256_i32_7 = arith.constant 256 : i32
    %13 = arith.cmpi sge, %10, %c256_i32_7 : i32
    %14 = arith.extui %13 : i1 to i32
    %c0_i32_8 = arith.constant 0 : i32
    %15 = arith.cmpi ne, %14, %c0_i32_8 : i32
    scf.if %15 {
      %cst = arith.constant 1.000000e+00 : f32
      %27 = vector.broadcast %cst : f32 to vector<1x256xf32>
      %cst_15 = arith.constant 0.000000e+00 : f32
      %28 = vector.broadcast %cst_15 : f32 to vector<1x256xf32>
      %29 = tpu.concatenate %6, %8, %27, %28 in 0 : vector<3x256xf32>, vector<3x256xf32>, vector<1x256xf32>, vector<1x256xf32> -> vector<8x256xf32>
      %c0_16 = arith.constant 0 : index
      %c0_17 = arith.constant 0 : index
      %30 = vector.load %arg6[%c0_16, %c0_17] : memref<8x8xf32, #tpu.memory_space<vmem>>, vector<8x8xf32>
      %cst_18 = arith.constant dense<0.000000e+00> : vector<8x8xf32>
      %31 = tpu.matmul %29, %29, %cst_18 {dimension_numbers = #tpu.dot_dimension_numbers<[1], [1], [0], [0], [0, 0, 1, 0], [], []>} : vector<8x256xf32>, vector<8x256xf32>, vector<8x8xf32> -> vector<8x8xf32>
      %32 = arith.addf %30, %31 : vector<8x8xf32>
      %c0_19 = arith.constant 0 : index
      %c0_20 = arith.constant 0 : index
      %33 = vector.load %arg6[%c0_19, %c0_20] : memref<8x8xf32, #tpu.memory_space<vmem>>, vector<8x8xf32>
      tpu.vector_store %arg6[%c0_19, %c0_20], %32 {strides = array<i32>} : memref<8x8xf32, #tpu.memory_space<vmem>>, vector<8x8xf32>,
    } else {
    }
    %c0_i32_9 = arith.constant 0 : i32
    %16 = arith.cmpi sgt, %10, %c0_i32_9 : i32
    %c256_i32_10 = arith.constant 256 : i32
    %17 = arith.cmpi slt, %10, %c256_i32_10 : i32
    %18 = arith.andi %16, %17 : i1
    %19 = arith.extui %18 : i1 to i32
    %c0_i32_11 = arith.constant 0 : i32
    %20 = arith.cmpi ne, %19, %c0_i32_11 : i32
    scf.if %20 {
      %27 = tpu.iota {dimensions = array<i32: 1>} : vector<3x256xi32>
      %28 = vector.broadcast %10 : i32 to vector<3x256xi32>
      %29 = arith.cmpi slt, %27, %28 : vector<3x256xi32>
      %30 = vector.broadcast %12 : i32 to vector<3x256xi32>
      %31 = arith.cmpi slt, %27, %30 : vector<3x256xi32>
      %c0_i32_15 = arith.constant 0 : i32
      %32 = arith.sitofp %c0_i32_15 : i32 to f32
      %33 = vector.broadcast %32 : f32 to vector<3x256xf32>
      %34 = arith.select %29, %6, %33 : vector<3x256xi1>, vector<3x256xf32>
      %c0_i32_16 = arith.constant 0 : i32
      %35 = arith.sitofp %c0_i32_16 : i32 to f32
      %36 = vector.broadcast %35 : f32 to vector<3x256xf32>
      %37 = arith.select %29, %8, %36 : vector<3x256xi1>, vector<3x256xf32>
      %cst = arith.constant 1.000000e+00 : f32
      %38 = vector.broadcast %cst : f32 to vector<1x256xf32>
      %cst_17 = arith.constant 0.000000e+00 : f32
      %39 = vector.broadcast %cst_17 : f32 to vector<1x256xf32>
      %40 = tpu.concatenate %34, %37, %38, %39 in 0 : vector<3x256xf32>, vector<3x256xf32>, vector<1x256xf32>, vector<1x256xf32> -> vector<8x256xf32>
      %c0_18 = arith.constant 0 : index
      %c0_19 = arith.constant 0 : index
      %41 = vector.load %arg6[%c0_18, %c0_19] : memref<8x8xf32, #tpu.memory_space<vmem>>, vector<8x8xf32>
      %cst_20 = arith.constant dense<0.000000e+00> : vector<8x8xf32>
      %42 = tpu.matmul %40, %40, %cst_20 {dimension_numbers = #tpu.dot_dimension_numbers<[1], [1], [0], [0], [0, 0, 1, 0], [], []>} : vector<8x256xf32>, vector<8x256xf32>, vector<8x8xf32> -> vector<8x8xf32>
      %43 = arith.addf %41, %42 : vector<8x8xf32>
      %c0_21 = arith.constant 0 : index
      %c0_22 = arith.constant 0 : index
      %44 = vector.load %arg6[%c0_21, %c0_22] : memref<8x8xf32, #tpu.memory_space<vmem>>, vector<8x8xf32>
      tpu.vector_store %arg6[%c0_21, %c0_22], %43 {strides = array<i32>} : memref<8x8xf32, #tpu.memory_space<vmem>>, vector<8x8xf32>,
      %cst_23 = arith.constant dense<true> : vector<3x256xi1>
      %45 = arith.xori %29, %cst_23 : vector<3x256xi1>
      %46 = arith.andi %45, %31 : vector<3x256xi1>
      %c0_i32_24 = arith.constant 0 : i32
      %47 = arith.sitofp %c0_i32_24 : i32 to f32
      %48 = vector.broadcast %47 : f32 to vector<3x256xf32>
      %49 = arith.select %46, %8, %48 : vector<3x256xi1>, vector<3x256xf32>
      %cst_25 = arith.constant 1.000000e+00 : f32
      %50 = vector.broadcast %cst_25 : f32 to vector<1x256xf32>
      %c0_26 = arith.constant 0 : index
      %c0_27 = arith.constant 0 : index
      %51 = vector.load %arg7[%c0_26, %c0_27] : memref<1x3xf32, #tpu.memory_space<vmem>>, vector<1x3xf32>
      %cst_28 = arith.constant dense<0.000000e+00> : vector<1x3xf32>
      %52 = tpu.matmul %50, %49, %cst_28 {dimension_numbers = #tpu.dot_dimension_numbers<[1], [1], [0], [0], [0, 0, 1, 0], [], []>} : vector<1x256xf32>, vector<3x256xf32>, vector<1x3xf32> -> vector<1x3xf32>
      %53 = arith.addf %51, %52 : vector<1x3xf32>
      %c0_29 = arith.constant 0 : index
      %c0_30 = arith.constant 0 : index
      %54 = vector.load %arg7[%c0_29, %c0_30] : memref<1x3xf32, #tpu.memory_space<vmem>>, vector<1x3xf32>
      tpu.vector_store %arg7[%c0_29, %c0_30], %53 {strides = array<i32>} : memref<1x3xf32, #tpu.memory_space<vmem>>, vector<1x3xf32>,
    } else {
    }
    %c0_i32_12 = arith.constant 0 : i32
    %21 = arith.cmpi sle, %10, %c0_i32_12 : i32
    %22 = arith.extui %21 : i1 to i32
    %c0_i32_13 = arith.constant 0 : i32
    %23 = arith.cmpi ne, %22, %c0_i32_13 : i32
    scf.if %23 {
      %27 = tpu.iota {dimensions = array<i32: 1>} : vector<3x256xi32>
      %28 = vector.broadcast %12 : i32 to vector<3x256xi32>
      %29 = arith.cmpi slt, %27, %28 : vector<3x256xi32>
      %c0_i32_15 = arith.constant 0 : i32
      %30 = arith.sitofp %c0_i32_15 : i32 to f32
      %31 = vector.broadcast %30 : f32 to vector<3x256xf32>
      %32 = arith.select %29, %8, %31 : vector<3x256xi1>, vector<3x256xf32>
      %cst = arith.constant 1.000000e+00 : f32
      %33 = vector.broadcast %cst : f32 to vector<1x256xf32>
      %c0_16 = arith.constant 0 : index
      %c0_17 = arith.constant 0 : index
      %34 = vector.load %arg7[%c0_16, %c0_17] : memref<1x3xf32, #tpu.memory_space<vmem>>, vector<1x3xf32>
      %cst_18 = arith.constant dense<0.000000e+00> : vector<1x3xf32>
      %35 = tpu.matmul %33, %32, %cst_18 {dimension_numbers = #tpu.dot_dimension_numbers<[1], [1], [0], [0], [0, 0, 1, 0], [], []>} : vector<1x256xf32>, vector<3x256xf32>, vector<1x3xf32> -> vector<1x3xf32>
      %36 = arith.addf %34, %35 : vector<1x3xf32>
      %c0_19 = arith.constant 0 : index
      %c0_20 = arith.constant 0 : index
      %37 = vector.load %arg7[%c0_19, %c0_20] : memref<1x3xf32, #tpu.memory_space<vmem>>, vector<1x3xf32>
      tpu.vector_store %arg7[%c0_19, %c0_20], %36 {strides = array<i32>} : memref<1x3xf32, #tpu.memory_space<vmem>>, vector<1x3xf32>,
    } else {
    }
    %c1_i32 = arith.constant 1 : i32
    %24 = arith.cmpi eq, %arg1, %c1_i32 : i32
    %25 = arith.extui %24 : i1 to i32
    %c0_i32_14 = arith.constant 0 : i32
    %26 = arith.cmpi ne, %25, %c0_i32_14 : i32
    scf.if %26 {
      %c0_15 = arith.constant 0 : index
      %c0_16 = arith.constant 0 : index
      %27 = vector.load %arg6[%c0_15, %c0_16] : memref<8x8xf32, #tpu.memory_space<vmem>>, vector<8x8xf32>
      %28 = arith.sitofp %1 : i32 to f32
      %cst = arith.constant 1.000000e+00 : f32
      %29 = arith.divf %cst, %28 : f32
      %30 = vector.extract_strided_slice %27 {offsets = [0, 3], sizes = [3, 3], strides = [1, 1]} : vector<8x8xf32> to vector<3x3xf32>
      %31 = vector.extract_strided_slice %27 {offsets = [0, 6], sizes = [3, 1], strides = [1, 1]} : vector<8x8xf32> to vector<3x1xf32>
      %32 = vector.extract_strided_slice %27 {offsets = [6, 3], sizes = [1, 3], strides = [1, 1]} : vector<8x8xf32> to vector<1x3xf32>
      %33 = tpu.iota {dimensions = array<i32: 0>} : vector<3x3xi32>
      %34 = tpu.iota {dimensions = array<i32: 1>} : vector<3x3xi32>
      %35 = arith.cmpi eq, %33, %34 : vector<3x3xi32>
      %36 = arith.extui %35 : vector<3x3xi1> to vector<3x3xi32>
      %37 = arith.sitofp %36 : vector<3x3xi32> to vector<3x3xf32>
      %38 = vector.extract_strided_slice %27 {offsets = [0, 0], sizes = [3, 3], strides = [1, 1]} : vector<8x8xf32> to vector<3x3xf32>
      %39 = arith.mulf %37, %38 : vector<3x3xf32>
      %cst_17 = arith.constant dense<0.000000e+00> : vector<3xf32>
      %40 = vector.multi_reduction <add>, %39, %cst_17 [1] : vector<3x3xf32> to vector<3xf32>
      %41 = vector.shape_cast %40 : vector<3xf32> to vector<3x1xf32>
      %42 = vector.extract_strided_slice %27 {offsets = [3, 3], sizes = [3, 3], strides = [1, 1]} : vector<8x8xf32> to vector<3x3xf32>
      %43 = arith.mulf %37, %42 : vector<3x3xf32>
      %cst_18 = arith.constant dense<0.000000e+00> : vector<3xf32>
      %44 = vector.multi_reduction <add>, %43, %cst_18 [0] : vector<3x3xf32> to vector<3xf32>
      %45 = vector.shape_cast %44 : vector<3xf32> to vector<1x3xf32>
      %c0_19 = arith.constant 0 : index
      %c0_20 = arith.constant 0 : index
      %46 = vector.load %arg7[%c0_19, %c0_20] : memref<1x3xf32, #tpu.memory_space<vmem>>, vector<1x3xf32>
      %47 = arith.addf %32, %46 : vector<1x3xf32>
      %48 = vector.broadcast %29 : f32 to vector<3x1xf32>
      %49 = arith.mulf %31, %48 : vector<3x1xf32>
      %50 = vector.broadcast %29 : f32 to vector<1x3xf32>
      %51 = arith.mulf %47, %50 : vector<1x3xf32>
      %52 = arith.mulf %31, %49 : vector<3x1xf32>
      %53 = arith.subf %41, %52 : vector<3x1xf32>
      %cst_21 = arith.constant 2.000000e+00 : f32
      %54 = vector.broadcast %cst_21 : f32 to vector<1x3xf32>
      %55 = arith.mulf %54, %51 : vector<1x3xf32>
      %56 = arith.mulf %55, %32 : vector<1x3xf32>
      %57 = arith.subf %45, %56 : vector<1x3xf32>
      %58 = vector.broadcast %28 : f32 to vector<1x3xf32>
      %59 = arith.mulf %58, %51 : vector<1x3xf32>
      %60 = arith.mulf %59, %51 : vector<1x3xf32>
      %61 = arith.addf %57, %60 : vector<1x3xf32>
      %62 = vector.broadcast %49 : vector<3x1xf32> to vector<3x3xf32>
      %63 = vector.broadcast %32 : vector<1x3xf32> to vector<3x3xf32>
      %64 = arith.mulf %62, %63 : vector<3x3xf32>
      %65 = arith.subf %30, %64 : vector<3x3xf32>
      %cst_22 = arith.constant 1.000000e-16 : f32
      %66 = vector.broadcast %cst_22 : f32 to vector<1x3xf32>
      %67 = arith.addf %61, %66 : vector<1x3xf32>
      %cst_23 = arith.constant 1.000000e+00 : f32
      %68 = vector.broadcast %cst_23 : f32 to vector<1x3xf32>
      %69 = arith.divf %68, %67 : vector<1x3xf32>
      %70 = arith.mulf %65, %65 : vector<3x3xf32>
      %71 = vector.broadcast %61 : vector<1x3xf32> to vector<3x3xf32>
      %72 = arith.mulf %70, %71 : vector<3x3xf32>
      %73 = arith.mulf %69, %69 : vector<1x3xf32>
      %74 = vector.broadcast %73 : vector<1x3xf32> to vector<3x3xf32>
      %75 = arith.mulf %72, %74 : vector<3x3xf32>
      %cst_24 = arith.constant 2.000000e+00 : f32
      %76 = vector.broadcast %cst_24 : f32 to vector<3x3xf32>
      %77 = arith.mulf %76, %70 : vector<3x3xf32>
      %78 = vector.broadcast %69 : vector<1x3xf32> to vector<3x3xf32>
      %79 = arith.mulf %77, %78 : vector<3x3xf32>
      %80 = vector.broadcast %53 : vector<3x1xf32> to vector<3x3xf32>
      %81 = arith.subf %80, %79 : vector<3x3xf32>
      %82 = arith.addf %81, %75 : vector<3x3xf32>
      %cst_25 = arith.constant 0.000000e+00 : f32
      %83 = vector.broadcast %cst_25 : f32 to vector<3x3xf32>
      %84 = arith.maximumf %82, %83 : vector<3x3xf32>
      %cst_26 = arith.constant 1.000000e-16 : f32
      %85 = vector.broadcast %cst_26 : f32 to vector<3x3xf32>
      %86 = arith.addf %84, %85 : vector<3x3xf32>
      %87 = arith.divf %75, %86 : vector<3x3xf32>
      %cst_27 = arith.constant 1.000000e-16 : f32
      %88 = vector.broadcast %cst_27 : f32 to vector<3x3xf32>
      %89 = arith.addf %87, %88 : vector<3x3xf32>
      %90 = math.log %89 : vector<3x3xf32>
      %cst_28 = arith.constant 0.434294492 : f32
      %91 = vector.broadcast %cst_28 : f32 to vector<3x3xf32>
      %92 = arith.mulf %90, %91 : vector<3x3xf32>
      %cst_29 = arith.constant 1.000000e+01 : f32
      %93 = vector.broadcast %cst_29 : f32 to vector<3x3xf32>
      %94 = arith.mulf %93, %92 : vector<3x3xf32>
      %c0_30 = arith.constant 0 : index
      %c0_31 = arith.constant 0 : index
      %c0_32 = arith.constant 0 : index
      %95 = vector.load %arg5[%c0_30, %c0_31, %c0_32] : memref<1x3x3xf32, #tpu.memory_space<vmem>>, vector<1x3x3xf32>
      %96 = vector.shape_cast %95 : vector<1x3x3xf32> to vector<3x3xf32>
      %97 = vector.shape_cast %94 : vector<3x3xf32> to vector<1x3x3xf32>
      tpu.vector_store %arg5[%c0_30, %c0_31, %c0_32], %97 {strides = array<i32>} : memref<1x3x3xf32, #tpu.memory_space<vmem>>, vector<1x3x3xf32>,
    } else {
    }
    return
  }
  func.func @transform_0(%arg0: i32, %arg1: i32, %arg2: memref<2xi32, #tpu.memory_space<smem>>) -> (i32, i32, i32) {
    %c0_i32 = arith.constant 0 : i32
    %c0_i32_0 = arith.constant 0 : i32
    return %arg0, %c0_i32, %arg1 : i32, i32, i32
  }
  func.func @transform_1(%arg0: i32, %arg1: i32, %arg2: memref<2xi32, #tpu.memory_space<smem>>) -> (i32, i32, i32) {
    %c0_i32 = arith.constant 0 : i32
    %c0_i32_0 = arith.constant 0 : i32
    return %arg0, %c0_i32, %arg1 : i32, i32, i32
  }
  func.func @transform_2(%arg0: i32, %arg1: i32, %arg2: memref<2xi32, #tpu.memory_space<smem>>) -> (i32, i32, i32) {
    %c0_i32 = arith.constant 0 : i32
    %c0_i32_0 = arith.constant 0 : i32
    %c0_i32_1 = arith.constant 0 : i32
    return %arg0, %c0_i32, %c0_i32_0 : i32, i32, i32
  }
}

</mosaic_0001>

<bundles_post_ra>
// kernel: tpu_custom_call.1
= control target key start
LH: loop header
LB: loop body
LE: loop exit
PB: predicated region body
PF: predicated region fallthrough
CT: control target
= control target key end

     0   :  { %s940_s15 = smov [#allocation5]   ;;  %s1117_s0 = inlined_call_operand.vmem [shape: s32[2], index: 0, kind: input, shape index: {}]   ;;  %s1118_s1 = inlined_call_operand.vmem [shape: f32[2,3,300], index: 1, kind: input, shape index: {}]   ;;  %s1119_s2 = inlined_call_operand.vmem [shape: f32[2,3,300], index: 2, kind: input, shape index: {}]   ;;  %s1120_s3 = inlined_call_operand.vmem [shape: f32[2,3,3], index: 3, kind: output, shape index: {}]  }
   0x1   :  { %s9_s14 = sshll.u32 %s1117_s0, 4  ;;  %s10_s14 = int_to_ptr.vmem [resolvable:$true] %s9_s14 }
   0x2   :  { %12 = dma.vmem_to_smem %s10_s14, 16, %s940_s15, [#allocation4] }
   0x3   :  { %918 = dma.done.wait [#allocation4], 16 }
   0x4   :  { %919 = vsyncadd [#allocation4], 4294967280 }
   0x5   :  { %15 = sfence }
   0x6   :  { %s972_s16 = smov 0   ;;  %s974_s17 = smov 0  }
   0x7   :  { %s976_s18 = smov 0   ;;  %s978_s19 = smov 0  }
   0x8   :  { %s980_s20 = smov 0  }
   0x9 LB: > { %s30_s0 = sadd.s32 1, %s930_s18  ;;  %s33_s21 = sadd.s32 1, %s934_s19  ;;  %s938_s20 = sphi %s980_s20, %s21_s20   ;;  %s934_s19 = sphi %s978_s19, %s1132_s19   ;;  %s930_s18 = sphi %s976_s18, %s1131_s18   ;;  %s926_s17 = sphi %s974_s17, %s1130_s17   ;;  %s922_s16 = sphi %s972_s16, %s1129_s16  }
   0xa   : > { %p31_p0 = scmp.ge.s32.totalorder %s30_s0, 2  ;;  %p796_p1 = scmp.ge.s32.totalorder %s938_s20, 1 }
   0xb   : > { %p173_p2 = scmp.lt.s32.totalorder %s938_s20, 5 }
   0xc   : > { %s1134_s0 = smov (%p31_p0, %s30_s0), 0  ;;  %s1136_s21 = smov (!%p31_p0, %s33_s21), %s934_s19 }
   0xd   : > { %p174_p3 = pnand %p796_p1, %p173_p2  ;;  %p35_p4 = scmp.ge.s32.totalorder %s1136_s21, 2 }
   0xe   : > { %s797_s22 = sshll.u32 (!%p174_p3), %s922_s16, 1  ;;  %p220_p5 = scmp.lt.s32.totalorder (!%p174_p3), %s926_s17, 1 }
   0xf   : > { %s1138_s21 = smov (%p35_p4, %s1136_s21), 0  ;;  %177 = sbr.rel (%p174_p3) target bundleno = 1073 (0x431), region = 28 }
  0x10   : > { %p222_p6 = scmp.lt.s32.totalorder (!%p174_p3), %s797_s22, 2  ;;  %s1005_s23 = sld [smem:[#allocation5 + %s926_s17]] (!%p174_p3) }
  0x11   : > { %p802_p7 = scmp.ne.s32.totalorder (!%p174_p3), %s922_s16, 0 }
  0x14   : > { %s1140_s17 = smov (!%p220_p5, %s926_s17), 1  ;;  %s1142_s22 = smov (!%p222_p6, %s797_s22), 2 }
  0x15   : > { %s822_s24 = smul.u32 3, %s1140_s17  ;;  %s801_s25 = sshll.u32 %s1140_s17, 2 }
  0x16   : > { %s1010_s28 = scalar_lea.vmem %s1120_s3, %s801_s25  ;;  %259 = sbr.rel (%p802_p7) target bundleno = 30 (0x1e), region = 32 }
  0x17   : > { %s225_s29 = sadd.s32 %s822_s24, %s1142_s22 }
  0x18   : > { %s798_s30 = sshll.u32 %s225_s29, 2 }
  0x19   : > { %s227_s6 = scalar_lea.vmem %s1118_s1, %s798_s30  ;;  %s245_s9 = scalar_lea.vmem %s1119_s2, %s798_s30 }
  0x1b   : > { %vm260_vm0 = vcmask 64512   ;;  %vm262_vm1 = vcmask 16384   ;;  %v941_v0 = vmov 0.0  }
  0x1c   : > { %261 = vst.msk [vmem:[#allocation2] sm:$0xff] %vm260_vm0, %v941_v0 }
  0x1d   : > { %263 = vst.msk [vmem:[#allocation3] sm:$0x1] %vm262_vm1, %v941_v0 }
  0x1e PF: > { %v264_v1 = vld [vmem:[%s227_s6] sm:$0x77]  ;;  %s803_s10 = sshll.u32 %s922_s16, 8 }
  0x1f   : > { %v1019_v2 = vld [vmem:[%s245_s9] sm:$0x77]  ;;  %s1023_s11 = ssub.s32 %s1005_s23, %s803_s10  ;;  %s268_s12 = ssub.s32 300, %s803_s10 }
  0x20   : > { %p269_p8 = scmp.lt.s32.totalorder %s268_s12, 256  ;;  %p804_p9 = scmp.lt.s32.totalorder %s1023_s11, 256 }
  0x22   : > { %s1144_s12 = smov (!%p269_p8, %s268_s12), 256  ;;  %274 = sbr.rel (%p804_p9) target bundleno = 193 (0xc1), region = 36 }
  0x27   : > { %276 = vst [vmem:[#allocation1] ss:$2 sm:$0xff] %v264_v1  ;;  %vm289_vm2 = vcmask 1042432   ;;  %vm292_vm3 = vcmask 1045504   ;;  %vm295_vm4 = vcmask 1046528   ;;  %v298_v14 = vld [vmem:[#allocation2] sm:$0xff] }
  0x28   : > { %vm340_vm5 = vcmask 64512  }
  0x2e   : > { %v277_v3 = vld.sshfl [vmem:[#allocation1] sm:$0xff pattern:$0x75316420]  ;;  %v278_v4 = vld.sshfl [vmem:[#allocation1 + $0x8] sm:$0xff pattern:$0x75316420] }
  0x2f   : > { %282 = vst [vmem:[#allocation1] ss:$2 sm:$0xff] %v1019_v2 }
  0x36   : > { %v283_v5 = vld.sshfl [vmem:[#allocation1] sm:$0xff pattern:$0x75316420]  ;;  %v284_v6 = vld.sshfl [vmem:[#allocation1 + $0x8] sm:$0xff pattern:$0x75316420] }
  0x37   : > { %v285_v7 = vrot.slane %v283_v5, 5  ;;  %v286_v8 = vrot.slane %v284_v6, 5 }
  0x39   : > { %v290_v9 = vsel %vm289_vm2, %v277_v3, %v285_v7  ;;  %v291_v10 = vsel %vm289_vm2, %v278_v4, %v286_v8 }
  0x3a   : > { %v293_v11 = vsel %vm292_vm3, %v290_v9, 1.0  ;;  %v294_v12 = vsel %vm292_vm3, %v291_v10, 1.0 }
  0x3b   : > { %805 = vmatpush.xpose.msk.msra.mxu0 %vm295_vm4, %v293_v11  ;;  %807 = vmatpush.xpose.msk.msra.mxu1 %vm295_vm4, %v294_v12 }
  0x3e   : > { %806 = vmatmul.msk.f32.vlgmr.msra.gmra.mxu0 %vm295_vm4, %v293_v11  ;;  %808 = vmatmul.msk.f32.vlgmr.msra.gmra.mxu1 %vm295_vm4, %v294_v12 }
  0xbb   : > { %v316_v13 = vpop.f32.mrf.mxu0  ;;  %v336_v15 = vpop.f32.mrf.mxu1 }
  0xbc   : > { %v337_v16 = vadd.f32 %v336_v15, %v316_v13 }
  0xbe   : > { %v339_v17 = vadd.f32 %v337_v16, %v298_v14 }
  0xc0   : > { %341 = vst.msk [vmem:[#allocation2] sm:$0xff] %vm340_vm5, %v339_v17 }
  0xc1 PF: > { %p342_p10 = scmp.gt.s32.totalorder %s1023_s11, 0 }
  0xc3   : > { %p344_p11 = pnand %p804_p9, %p342_p10 }
  0xc5   : > { %347 = sbr.rel (%p344_p11) target bundleno = 366 (0x16e), region = 40 }
  0xca   : > { %358 = vst [vmem:[#allocation1] ss:$2 sm:$0xff] %v264_v1  ;;  %v348_v18 = vlaneseq  ;;  %v351_v22 = vstv %s1023_s11  ;;  %v354_v25 = vstv %s1144_s12  ;;  %vm379_vm7 = vcmask 1042432   ;;  %v388_v45 = vld [vmem:[#allocation2] sm:$0xff]  ;;  %v443_v50 = vld [vmem:[#allocation3] sm:$0x1] }
  0xcb   : > { %vm942_vm10 = vmmov 1   ;;  %vm382_vm12 = vcmask 1045504   ;;  %vm385_vm15 = vcmask 1046528   ;;  %v943_v43 = vmov 1.0  }
  0xcc   : > { %v349_v19 = vand.u32 127, %v348_v18  ;;  %vm430_vm2 = vcmask 64512   ;;  %vm485_vm3 = vcmask 16384  }
  0xce   : > { %v350_v23 = vadd.s32 128, %v349_v19  ;;  %vm1038_vm6 = vcmp.lt.s32.totalorder %v349_v19, %v351_v22  ;;  %vm1056_vm9 = vcmp.lt.s32.totalorder %v349_v19, %v354_v25 }
  0xcf   : > { %vm1062_vm11 = vmxor %vm1038_vm6, %vm942_vm10 }
  0xd0   : > { %vm1043_vm8 = vcmp.lt.s32.totalorder %v350_v23, %v351_v22  ;;  %vm356_vm13 = vcmp.lt.s32.totalorder %v350_v23, %v354_v25  ;;  %vm434_vm0 = vmand %vm1062_vm11, %vm1056_vm9 }
  0xd1   : > { %v359_v20 = vld.sshfl [vmem:[#allocation1] sm:$0xff pattern:$0x75316420]  ;;  %v360_v21 = vld.sshfl [vmem:[#allocation1 + $0x8] sm:$0xff pattern:$0x75316420]  ;;  %vm433_vm14 = vmxor %vm1043_vm8, %vm942_vm10 }
  0xd2   : > { %366 = vst [vmem:[#allocation1] ss:$2 sm:$0xff] %v1019_v2  ;;  %v363_v31 = vsel %vm1038_vm6, %v359_v20, 0.0  ;;  %v364_v32 = vsel %vm1043_vm8, %v360_v21, 0.0  ;;  %vm435_vm1 = vmand %vm433_vm14, %vm356_vm13 }
  0xd9   : > { %v367_v26 = vld.sshfl [vmem:[#allocation1] sm:$0xff pattern:$0x75316420]  ;;  %v368_v27 = vld.sshfl [vmem:[#allocation1 + $0x8] sm:$0xff pattern:$0x75316420] }
  0xda   : > { %v371_v29 = vsel %vm1038_vm6, %v367_v26, 0.0  ;;  %436 = vst [vmem:[#allocation1] ss:$2 sm:$0xff] %v1019_v2  ;;  %v372_v30 = vsel %vm1043_vm8, %v368_v27, 0.0 }
  0xdb   : > { %v375_v35 = vrot.slane %v371_v29, 5  ;;  %v376_v36 = vrot.slane %v372_v30, 5 }
  0xdd   : > { %v380_v37 = vsel %vm379_vm7, %v363_v31, %v375_v35  ;;  %v381_v38 = vsel %vm379_vm7, %v364_v32, %v376_v36 }
  0xde   : > { %v383_v39 = vsel %vm382_vm12, %v380_v37, 1.0  ;;  %v384_v40 = vsel %vm382_vm12, %v381_v38, 1.0 }
  0xdf   : > { %809 = vmatpush.xpose.msk.msra.mxu0 %vm385_vm15, %v383_v39  ;;  %811 = vmatpush.xpose.msk.msra.mxu1 %vm385_vm15, %v384_v40 }
  0xe1   : > { %v437_v41 = vld.sshfl [vmem:[#allocation1] sm:$0xff pattern:$0x75316420]  ;;  %v438_v42 = vld.sshfl [vmem:[#allocation1 + $0x8] sm:$0xff pattern:$0x75316420] }
  0xe2   : > { %813 = vmatpush.xpose.msk.msra.mxu2 %vm434_vm0, %v437_v41  ;;  %814 = vmatpush.xpose.msk.msra.mxu3 %vm435_vm1, %v438_v42 }
  0xe3   : > { %810 = vmatmul.msk.f32.vlgmr.msra.gmra.mxu0 %vm385_vm15, %v383_v39  ;;  %812 = vmatmul.msk.f32.vlgmr.msra.gmra.mxu1 %vm385_vm15, %v384_v40 }
  0xe5   : > { %460 = vmatmul.f32.vlgmr.msra.gmra.mxu2 %v943_v43  ;;  %480 = vmatmul.f32.vlgmr.msra.gmra.mxu3 %v943_v43 }
 0x160   : > { %v406_v44 = vpop.f32.mrf.mxu0  ;;  %v426_v46 = vpop.f32.mrf.mxu1 }
 0x161   : > { %v427_v47 = vadd.f32 %v426_v46, %v406_v44 }
 0x163   : > { %v429_v48 = vadd.f32 %v427_v47, %v388_v45 }
 0x165   : > { %431 = vst.msk [vmem:[#allocation2] sm:$0xff] %vm430_vm2, %v429_v48 }
 0x168   : > { %v461_v49 = vpop.f32.mrf.mxu2  ;;  %v481_v51 = vpop.f32.mrf.mxu3 }
 0x169   : > { %v482_v52 = vadd.f32 %v481_v51, %v461_v49 }
 0x16b   : > { %v484_v53 = vadd.f32 %v482_v52, %v443_v50 }
 0x16d   : > { %486 = vst.msk [vmem:[#allocation3] sm:$0x1] %vm485_vm3, %v484_v53 }
 0x16e PF: > { %490 = sbr.rel (%p342_p10) target bundleno = 513 (0x201), region = 44 }
 0x173   : > { %v491_v54 = vlaneseq  ;;  %498 = vst [vmem:[#allocation1] ss:$2 sm:$0xff] %v1019_v2  ;;  %v494_v56 = vstv %s1144_s12  ;;  %v944_v60 = vmov 1.0   ;;  %vm547_vm6 = vcmask 16384  }
 0x174   : > { %v505_v62 = vld [vmem:[#allocation3] sm:$0x1] }
 0x175   : > { %v492_v55 = vand.u32 127, %v491_v54 }
 0x177   : > { %v493_v57 = vadd.s32 128, %v492_v55  ;;  %vm495_vm4 = vcmp.lt.s32.totalorder %v492_v55, %v494_v56 }
 0x179   : > { %vm496_vm5 = vcmp.lt.s32.totalorder %v493_v57, %v494_v56 }
 0x17a   : > { %v499_v58 = vld.sshfl [vmem:[#allocation1] sm:$0xff pattern:$0x75316420]  ;;  %v500_v59 = vld.sshfl [vmem:[#allocation1 + $0x8] sm:$0xff pattern:$0x75316420] }
 0x17b   : > { %816 = vmatpush.xpose.msk.msra.mxu0 %vm495_vm4, %v499_v58  ;;  %817 = vmatpush.xpose.msk.msra.mxu1 %vm496_vm5, %v500_v59 }
 0x17e   : > { %522 = vmatmul.f32.vlgmr.msra.gmra.mxu0 %v944_v60  ;;  %542 = vmatmul.f32.vlgmr.msra.gmra.mxu1 %v944_v60 }
 0x1fb   : > { %v523_v61 = vpop.f32.mrf.mxu0  ;;  %v543_v63 = vpop.f32.mrf.mxu1 }
 0x1fc   : > { %v544_v0 = vadd.f32 %v543_v63, %v523_v61 }
 0x1fe   : > { %v546_v1 = vadd.f32 %v544_v0, %v505_v62 }
 0x200   : > { %548 = vst.msk [vmem:[#allocation3] sm:$0x1] %vm547_vm6, %v546_v1 }
 0x201 PF: > { %p818_p12 = scmp.ne.s32.totalorder %s922_s16, 1 }
 0x202   : > { %s554_s13 = scvt.s32.f32 (!%p818_p12), %s1005_s23  ;;  %s945_s14 = smov (!%p818_p12), 3  }
 0x203   : > { %552 = sbr.rel (%p818_p12) target bundleno = 1073 (0x431), region = 48  ;;  %s947_s15 = smov (!%p818_p12), 125  }
 0x208   : > { %v877_v2 = vld [vmem:[#allocation3] ss:$0 sm:$0xff]  ;;  %v571_v3 = vlaneseq  ;;  %v555_v6 = vstv %s554_s13  ;;  %v1081_v7 = vld [vmem:[#allocation2] sm:$0xff]  ;;  %v946_v8 = vmov 0.0   ;;  %vm579_vm8 = vcmask 18432  }
 0x209   : > { %599 = vrot.lane.b32.xlu0 %v877_v2, %s945_s14  ;;  %878 = vrcp.f32 %v555_v6  ;;  %v584_v11 = vrot.slane %v1081_v7, 3  ;;  %v567_v15 = vand.u32 2147483648, %v555_v6  ;;  %vm561_vm9 = vweird.f32 %v555_v6 }
 0x20a   : > { %v572_v4 = vshrl.u32 %v571_v3, 7  ;;  %v574_v5 = vand.u32 127, %v571_v3  ;;  %v565_v17 = vand.u32 2147483647, %v555_v6  ;;  %v948_v25 = vmov 6  }
 0x20b   : > { %v568_v19 = vor.u32 1.1754944e-38, %v567_v15  ;;  %874 = vset.pattern.permute.xlu2 %v948_v25  ;;  %875 = vset.pattern.permute.xlu1 %v948_v25  ;;  %v630_v2 = vperm.slane %v1081_v7, 6 }
 0x20c   : > { %vm575_vm7 = vcmp.eq.s32.totalorder %v572_v4, %v574_v5  ;;  %vm566_vm12 = vcmp.eq.f32.partialorder %v565_v17, 8.507059e+37  ;;  %876 = vset.pattern.permute.xlu0 %v948_v25 }
 0x20d   : > { %v819_v9 = vsel %vm575_vm7, 1.0, %v946_v8 }
 0x20e   : > { %v578_v10 = vmul.f32 %v819_v9, %v1081_v7 }
 0x20f   : > { %v879_v13 = vpop.eup %878 }
 0x210   : > { %v580_v12 = vsel %vm579_vm8, %v578_v10, 0.0  ;;  %v557_v14 = vmul.f32 %v879_v13, %v555_v6  ;;  %vm562_vm10 = vweird.f32 %v879_v13 }
 0x211   : > { %581 = vadd.xlane.f32.xlu2 %v580_v12  ;;  %585 = vrot.lane.b32.xlu0 %v584_v11, %s947_s15  ;;  %vm563_vm11 = vmor %vm561_vm9, %vm562_vm10 }
 0x212   : > { %v558_v16 = vsub.f32 1.0, %v557_v14 }
 0x214   : > { %v559_v18 = vmul.f32 %v879_v13, %v558_v16 }
 0x216   : > { %v560_v20 = vadd.f32 %v879_v13, %v559_v18 }
 0x218   : > { %v564_v21 = vsel %vm563_vm11, %v879_v13, %v560_v20 }
 0x219   : > { %v569_v22 = vsel %vm566_vm12, %v568_v19, %v564_v21 }
 0x21a   : > { %823 = vpush %v569_v22 }
 0x24b   : > { %s824_s16 = spop %823 }
 0x24c   : > { %v603_v23 = vstv %s824_s16 }
 0x24d   : > { %v604_v24 = vmul.f32 %v603_v23, %v1081_v7 }
 0x24f   : > { %627 = vperm.xlu2 %874, %v604_v24   ;;  %v606_v0 = vmul.f32 %v604_v24, %v1081_v7 }
 0x27b   : > { %v600_v26 = vpop.permute.xlu0 %599 }
 0x27c   : > { %v602_v27 = vadd.f32 %v600_v26, %v1081_v7 }
 0x27e   : > { %v605_v28 = vmul.f32 %v603_v23, %v602_v27 }
 0x280   : > { %v608_v29 = vmul.f32 2.0, %v605_v28  ;;  %v617_v31 = vmul.f32 %v605_v28, %v555_v6 }
 0x282   : > { %v609_v30 = vmul.f32 %v608_v29, %v1081_v7  ;;  %v618_v33 = vmul.f32 %v617_v31, %v605_v28 }
 0x283   : > { %v586_v35 = vpop.permute.xlu0 %585 }
 0x284   : > { %v611_v32 = vrot.slane %v609_v30, 6  ;;  %v620_v34 = vrot.slane %v618_v33, 6  ;;  %v588_v36 = vmul.f32 %v819_v9, %v586_v35  ;;  %v582_v63 = vpop.xlane.xlu2 %581 }
 0x285   : > { %v607_v1 = vsub.f32 %v582_v63, %v606_v0 }
 0x286   : > { %612 = vrot.lane.b32.xlu1 %v611_v32, %s947_s15  ;;  %v589_v37 = vsel %vm579_vm8, %v588_v36, 0.0 }
 0x287   : > { %v590_v38 = vrot.slane %v589_v37, 4 }
 0x289   : > { %v591_v39 = vadd.f32 %v590_v38, %v589_v37 }
 0x28b   : > { %v592_v40 = vrot.slane %v591_v39, 2 }
 0x28d   : > { %v593_v41 = vadd.f32 %v592_v40, %v591_v39 }
 0x28e   : > { %621 = vrot.lane.b32.xlu1 %v620_v34, %s947_s15 }
 0x28f   : > { %v594_v42 = vrot.slane %v593_v41, 1 }
 0x291   : > { %v595_v44 = vadd.f32 %v594_v42, %v593_v41 }
 0x2a9   : > { %v628_v3 = vpop.permute.xlu2 %627 }
 0x2aa   : > { %v631_v4 = vmul.f32 %v630_v2, %v628_v3 }
 0x2ac   : > { %v632_v5 = vsub.f32 %v1081_v7, %v631_v4 }
 0x2ae   : > { %v649_v9 = vmul.f32 %v632_v5, %v632_v5 }
 0x2b0   : > { %v663_v10 = vmul.f32 2.0, %v649_v9 }
 0x2f8   : > { %v613_v43 = vpop.permute.xlu1 %612 }
 0x2f9   : > { %v615_v45 = vsub.f32 %v595_v44, %v613_v43 }
 0x300   : > { %v622_v46 = vpop.permute.xlu1 %621 }
 0x301   : > { %v624_v47 = vadd.f32 %v622_v46, %v615_v45 }
 0x303   : > { %v633_v48 = vadd.f32 1e-16, %v624_v47  ;;  %v650_v49 = vperm.slane %v624_v47, 0 }
 0x305   : > { %880 = vrcp.f32 %v633_v48  ;;  %652 = vrot.lane.b32.xlu0 %v650_v49, %s945_s14  ;;  %v645_v53 = vand.u32 2147483648, %v633_v48  ;;  %v643_v55 = vand.u32 2147483647, %v633_v48  ;;  %vm639_vm14 = vweird.f32 %v633_v48 }
 0x307   : > { %v646_v57 = vor.u32 1.1754944e-38, %v645_v53  ;;  %vm644_vm0 = vcmp.eq.f32.partialorder %v643_v55, 8.507059e+37 }
 0x30b   : > { %v881_v50 = vpop.eup %880 }
 0x30c   : > { %v635_v51 = vmul.f32 %v881_v50, %v633_v48  ;;  %vm640_vm13 = vweird.f32 %v881_v50 }
 0x30d   : > { %vm641_vm15 = vmor %vm639_vm14, %vm640_vm13 }
 0x30e   : > { %v636_v52 = vsub.f32 1.0, %v635_v51 }
 0x310   : > { %v637_v54 = vmul.f32 %v881_v50, %v636_v52 }
 0x312   : > { %v638_v56 = vadd.f32 %v881_v50, %v637_v54 }
 0x314   : > { %v642_v58 = vsel %vm641_vm15, %v881_v50, %v638_v56 }
 0x315   : > { %v647_v59 = vsel %vm644_vm0, %v646_v57, %v642_v58 }
 0x316   : > { %v664_v60 = vperm.slane %v647_v59, 0  ;;  %v656_v61 = vmul.f32 %v647_v59, %v647_v59 }
 0x318   : > { %666 = vrot.lane.b32.xlu1 %v664_v60, %s945_s14  ;;  %v657_v62 = vperm.slane %v656_v61, 0 }
 0x31a   : > { %659 = vrot.lane.b32.xlu0 %v657_v62, %s945_s14 }
 0x320   : > { %672 = vperm.xlu1 %875, %v607_v1  }
 0x377   : > { %v653_v6 = vpop.permute.xlu0 %652 }
 0x378   : > { %v655_v12 = vmul.f32 %v653_v6, %v649_v9 }
 0x38a   : > { %v667_v8 = vpop.permute.xlu1 %666 }
 0x38b   : > { %v669_v13 = vmul.f32 %v667_v8, %v663_v10 }
 0x38c   : > { %v660_v11 = vpop.permute.xlu0 %659 }
 0x38d   : > { %v662_v15 = vmul.f32 %v660_v11, %v655_v12 }
 0x392   : > { %v673_v14 = vpop.permute.xlu1 %672 }
 0x393   : > { %v675_v16 = vsub.f32 %v673_v14, %v669_v13 }
 0x395   : > { %v676_v17 = vadd.f32 %v675_v16, %v662_v15 }
 0x397   : > { %v677_v18 = vmax.f32 %v676_v17, 0.0 }
 0x399   : > { %v678_v19 = vadd.f32 1e-16, %v677_v18 }
 0x39b   : > { %882 = vrcp.f32 %v678_v19  ;;  %v690_v23 = vand.u32 2147483648, %v678_v19  ;;  %v688_v7 = vand.u32 2147483647, %v678_v19  ;;  %vm684_vm2 = vweird.f32 %v678_v19 }
 0x39d   : > { %v691_v26 = vor.u32 1.1754944e-38, %v690_v23  ;;  %vm689_vm4 = vcmp.eq.f32.partialorder %v688_v7, 8.507059e+37 }
 0x3a1   : > { %v883_v20 = vpop.eup %882 }
 0x3a2   : > { %v680_v21 = vmul.f32 %v883_v20, %v678_v19  ;;  %vm685_vm1 = vweird.f32 %v883_v20 }
 0x3a3   : > { %vm686_vm3 = vmor %vm684_vm2, %vm685_vm1 }
 0x3a4   : > { %v681_v22 = vsub.f32 1.0, %v680_v21 }
 0x3a6   : > { %v682_v24 = vmul.f32 %v883_v20, %v681_v22 }
 0x3a8   : > { %v683_v25 = vadd.f32 %v883_v20, %v682_v24 }
 0x3aa   : > { %v687_v27 = vsel %vm686_vm3, %v883_v20, %v683_v25 }
 0x3ab   : > { %v692_v28 = vsel %vm689_vm4, %v691_v26, %v687_v27 }
 0x3ac   : > { %v693_v29 = vmul.f32 %v692_v28, %v662_v15 }
 0x3ae   : > { %v694_v30 = vadd.f32 1e-16, %v693_v29 }
 0x3b0   : > { %884 = vlog2.f32 %v694_v30 }
 0x3b6   : > { %v885_v31 = vpop.eup %884 }
 0x3b7   : > { %v696_v32 = vmul.f32 0.6931472, %v885_v31 }
 0x3b9   : > { %v697_v33 = vmul.f32 0.4342945, %v696_v32 }
 0x3bb   : > { %v698_v34 = vmul.f32 10.0, %v697_v33 }
 0x3bd   : > { %700 = vrot.lane.b32.xlu0 %v698_v34, %s947_s15 }
 0x42f   : > { %v701_v35 = vpop.permute.xlu0 %700 }
 0x430   : > { %703 = vst.msk [vmem:[%s1010_s28] sm:$0x7] %vm579_vm8, %v701_v35 }
 0x431 PF: > { %s21_s20 = sadd.s32 1, %s938_s20   ;;  %s1129_s16 = smov %s930_s18 }
 0x432   : > { %p18_p13 = scmp.ge.s32.totalorder %s21_s20, 6   ;;  %s1130_s17 = smov %s934_s19 }
 0x433   : > { %s1131_s18 = smov %s1134_s0  ;;  %s1132_s19 = smov %s1138_s21 }
 0x434   :  { %20 = sbr.rel (!%p18_p13) target bundleno = 9 (0x9), region = 81 }

</bundles_post_ra>
